<compile_context>
chip_gen: v6e
topology: v6e:2x2x1
jax: 0.10.0
libtpu: 0.0.40
codegen_flags: <defaults>
</compile_context>

<pallas_src>
import jax
import jax.numpy as jnp
from jax.experimental import pallas as pl
from jax.experimental.pallas import tpu as pltpu


# ---------------------------------------------------------------------------
# Kernel
# ---------------------------------------------------------------------------
def _clamp06_kernel(x_ref, o_ref):
    # relu -> relu6 -> relu -> relu6 -> relu -> relu6 -> relu  ==  clamp(x, 0, 6)
    x = x_ref[...]
    zero = jnp.asarray(0, dtype=x.dtype)
    six = jnp.asarray(6, dtype=x.dtype)
    o_ref[...] = jnp.minimum(jnp.maximum(x, zero), six)


# ---------------------------------------------------------------------------
# Wrapper
# ---------------------------------------------------------------------------
_TARGET_BLOCK_BYTES = 4 << 20      # ~4 MiB per buffer (safe on v5e/v6e/v7x)
_VMEM_LIMIT_FLOOR = 32 << 20       # raise v5e's 16 MiB scoped default
_VMEM_LIMIT_CAP = 48 << 20         # stay under v7x's 64 MiB physical VMEM
_WIDTHS = (4096, 2048, 1024, 512, 256, 128)   # lane-dense last dims, widest first


def _sublane_multiple(dtype):
    itemsize = jnp.dtype(dtype).itemsize
    if itemsize >= 4:
        return 8
    if itemsize == 2:
        return 16
    return 32


def _clamp06_xla(x):
    zero = jnp.asarray(0, dtype=x.dtype)
    six = jnp.asarray(6, dtype=x.dtype)
    return jnp.minimum(jnp.maximum(x, zero), six)


def custom_module_forward(x, *, min_pallas_elems=1 << 20):
    """CustomModule forward (clamp to [0, 6]) as a tiled Pallas TPU kernel.

    `min_pallas_elems`: below this size the standalone pallas_call is not worth
    launching (XLA fuses the clamp into the producer anyway); set to 0 to force
    the Pallas path (used by the test below).
    """
    orig_shape = x.shape
    dtype = x.dtype
    n = x.size

    if n == 0:
        return x

    # Widest lane-dense width that divides the element count cleanly -> no pad,
    # no output slice.  NN activation sizes are virtually always 128-divisible.
    width = next((w for w in _WIDTHS if n % w == 0), None)

    if width is None or n < min_pallas_elems:
        # Odd / tiny shape: plain XLA clamp (already at HBM roofline, fusable).
        return _clamp06_xla(x)

    rows = n // width
    itemsize = jnp.dtype(dtype).itemsize
    sub = _sublane_multiple(dtype)

    # Byte-targeted row tile, rounded down to the sublane multiple so partial
    # final blocks stay (8,128)-legal (Pallas masks the ragged edge on store).
    budget_rows = max(1, _TARGET_BLOCK_BYTES // (width * itemsize))
    if budget_rows >= rows:
        block_rows = rows                                  # single full block
    else:
        block_rows = max(sub, (budget_rows // sub) * sub)

    block_bytes = block_rows * width * itemsize
    grid = pl.cdiv(rows, block_rows)

    # in+out double-buffering = 4 * block_bytes; add headroom, clamp to a value
    # that is physically safe on every generation (v7x physical VMEM = 64 MiB).
    vmem_limit = int(min(max(_VMEM_LIMIT_FLOOR, 4 * block_bytes + (4 << 20)),
                         _VMEM_LIMIT_CAP))

    x2d = x.reshape(rows, width)

    out2d = pl.pallas_call(
        _clamp06_kernel,
        out_shape=jax.ShapeDtypeStruct((rows, width), dtype),
        grid_spec=pltpu.PrefetchScalarGridSpec(
            num_scalar_prefetch=0,
            grid=(grid,),
            in_specs=[pl.BlockSpec((block_rows, width), lambda i: (i, 0))],
            out_specs=pl.BlockSpec((block_rows, width), lambda i: (i, 0)),
        ),
        compiler_params=pltpu.CompilerParams(
            dimension_semantics=("parallel",),
            vmem_limit_bytes=vmem_limit,
        ),
        cost_estimate=pl.CostEstimate(
            flops=2 * n,
            transcendentals=0,
            bytes_accessed=2 * n * itemsize,
        ),
    )(x2d)

    return out2d.reshape(orig_shape)


# ---------------------------------------------------------------------------
# Test
# ---------------------------------------------------------------------------
if __name__ == "__main__":
    key = jax.random.PRNGKey(0)

    # Small NCHW activation consistent with the module (elementwise on any shape).
    x = jax.random.normal(key, (2, 4, 16, 16), dtype=jnp.float32) * 5.0
    y_ref = jnp.minimum(jnp.maximum(x, 0.0), 6.0)

    # Force the Pallas path even though the tensor is tiny (exercise the kernel).
    y = custom_module_forward(x, min_pallas_elems=0)
    y = jax.block_until_ready(y)
    assert y.shape == x.shape and y.dtype == x.dtype
    assert jnp.allclose(y, y_ref), "Pallas path mismatch vs reference"

    # Default path (small-tensor bypass) must agree as well.
    y_bypass = jax.block_until_ready(custom_module_forward(x))
    assert jnp.allclose(y_bypass, y_ref), "bypass path mismatch vs reference"

    # Non-128-divisible shape takes the XLA fallback; still must be correct.
    x_odd = jax.random.normal(jax.random.PRNGKey(1), (3, 5, 7, 11),
                              dtype=jnp.float32) * 5.0
    y_odd = jax.block_until_ready(custom_module_forward(x_odd, min_pallas_elems=0))
    assert jnp.allclose(y_odd, jnp.minimum(jnp.maximum(x_odd, 0.0), 6.0))

    print("KERNEL_OK")
</pallas_src>

<mosaic_0001>
module attributes {stable_mosaic.version = 11 : i64} {
  func.func @_clamp06_kernel(%arg0: i32, %arg1: memref<1x2048xf32, #tpu.memory_space<vmem>>, %arg2: memref<1x2048xf32, #tpu.memory_space<vmem>>) attributes {dimension_semantics = [#tpu.dimension_semantics<parallel>], iteration_bounds = array<i64: 1>, scalar_prefetch = 0 : i64, scratch_operands = 0 : i64, tpu.core_type = #tpu.core_type<tc>, window_params = [{transform_indices = @transform_0, window_bounds = array<i64: 1, 2048>}, {transform_indices = @transform_1, window_bounds = array<i64: 1, 2048>}]} {
    %c0 = arith.constant 0 : index
    %c0_0 = arith.constant 0 : index
    %0 = vector.load %arg1[%c0, %c0_0] : memref<1x2048xf32, #tpu.memory_space<vmem>>, vector<1x2048xf32>
    %cst = arith.constant 0.000000e+00 : f32
    %1 = vector.broadcast %cst : f32 to vector<1x2048xf32>
    %2 = arith.maximumf %0, %1 : vector<1x2048xf32>
    %cst_1 = arith.constant 6.000000e+00 : f32
    %3 = vector.broadcast %cst_1 : f32 to vector<1x2048xf32>
    %4 = arith.minimumf %2, %3 : vector<1x2048xf32>
    %c0_2 = arith.constant 0 : index
    %c0_3 = arith.constant 0 : index
    %5 = vector.load %arg2[%c0_2, %c0_3] : memref<1x2048xf32, #tpu.memory_space<vmem>>, vector<1x2048xf32>
    tpu.vector_store %arg2[%c0_2, %c0_3], %4 {strides = array<i32>} : memref<1x2048xf32, #tpu.memory_space<vmem>>, vector<1x2048xf32>,
    return
  }
  func.func @transform_0(%arg0: i32) -> (i32, i32) {
    %c0_i32 = arith.constant 0 : i32
    %c0_i32_0 = arith.constant 0 : i32
    return %arg0, %c0_i32 : i32, i32
  }
  func.func @transform_1(%arg0: i32) -> (i32, i32) {
    %c0_i32 = arith.constant 0 : i32
    %c0_i32_0 = arith.constant 0 : i32
    return %arg0, %c0_i32 : i32, i32
  }
}

</mosaic_0001>

<bundles_post_ra>
// kernel: tpu_custom_call.1
= control target key start
LH: loop header
LB: loop body
LE: loop exit
PB: predicated region body
PF: predicated region fallthrough
CT: control target
= control target key end

     0   :  { %6 = vsyncpa [#allocation3], 0  ;;  %s108_s0 = inlined_call_operand.hbm [shape: f32[1,2048], index: 0, kind: input, shape index: {}]   ;;  %s109_s1 = inlined_call_operand.hbm [shape: f32[1,2048], index: 1, kind: output, shape index: {}]  }
   0x1   :  { %7 = vsyncpa [#allocation4], 0  ;;  %s90_s6 = smov [#allocation2]  }
   0x2   :  { %s14_s7 = sshll.u32 %s90_s6, 4  ;;  %s15_s7 = int_to_ptr.vmem [resolvable:$true] %s14_s7 }
   0x3   :  { %s54_s8 = scalar_lea.vmem %s15_s7, 256  ;;  %p59_p1 = scmp.lt.s32.totalorder %s15_s7, %s15_s7 }
   0x4   :  { %p55_p0 = scmp.ne.s32.totalorder %s15_s7, %s54_s8  ;;  %p60_p2 = scmp.lt.s32.totalorder %s54_s8, %s54_s8 }
   0x6   :  { %p61_p3 = por %p60_p2, %p59_p1 }
   0x8   :  { %p62_p4 = pnand %p61_p3, %p55_p0 }
   0xa   :  { %65 = shalt.err (!%p62_p4)
}
   0xb   :  { %17 = dma.hbm_to_vmem [thread:$0]  %s108_s0, 256, %s15_s7, [#allocation3]  }
   0xc   :  { %86 = dma.done.wait [#allocation3], 256  }
   0xd   :  { %87 = vsyncadd [#allocation3], 4294967040  ;;  %v21_v0 = vld [vmem:[#allocation2] sm:$0xff]  ;;  %v22_v1 = vld [vmem:[#allocation2 + $0x8] sm:$0xff]  ;;  %s91_s11 = smov [#allocation5]  }
   0xe   :  { %s35_s12 = sshll.u32 %s91_s11, 4  ;;  %v23_v2 = vmax.f32 %v21_v0, 0.0  ;;  %v24_v3 = vmax.f32 %v22_v1, 0.0  ;;  %s36_s12 = int_to_ptr.vmem [resolvable:$true] %s35_s12 }
   0xf   :  { %s66_s13 = scalar_lea.vmem %s36_s12, 256  ;;  %p71_p6 = scmp.lt.s32.totalorder %s36_s12, %s36_s12 }
  0x10   :  { %v25_v4 = vmin.f32 %v23_v2, 6.0  ;;  %v26_v5 = vmin.f32 %v24_v3, 6.0  ;;  %p67_p5 = scmp.ne.s32.totalorder %s36_s12, %s66_s13  ;;  %p72_p7 = scmp.lt.s32.totalorder %s66_s13, %s66_s13 }
  0x12   :  { %27 = vst [vmem:[#allocation5] sm:$0xff] %v25_v4  ;;  %28 = vst [vmem:[#allocation5 + $0x8] sm:$0xff] %v26_v5  ;;  %p73_p8 = por %p72_p7, %p71_p6 }
  0x14   :  { %p74_p9 = pnand %p73_p8, %p67_p5 }
  0x16   :  { %77 = shalt.err (!%p74_p9)
}
  0x17   :  { %38 = dma.vmem_to_hbm [thread:$0]  %s36_s12, 256, %s109_s1, [#allocation4]  }
  0x18   :  { %88 = dma.done.wait [#allocation4], 256  }
  0x19   :  { %89 = vsyncadd [#allocation4], 4294967040 }
  0x1a   :  { %42 = vsyncpa [#allocation3], 1 }
  0x1b   :  { %43 = vsyncpa [#allocation4], 1 }

</bundles_post_ra>
